<compile_context>
chip_gen: v7x
topology: tpu7x:2x2x1
jax: 0.10.0
libtpu: 0.0.40
codegen_flags: <defaults>
</compile_context>

<pallas_src>
import jax
import jax.numpy as jnp
from jax.experimental import pallas as pl
from jax.experimental.pallas import tpu as pltpu


# --------------------------------------------------------------------------
# Kernels
# --------------------------------------------------------------------------
def _masked_sum_step(hidden_ref, mask_ref, sum_ref, den_ref):
    """One (batch-tile, seq-tile) accumulation step of the masked reduction."""
    s = pl.program_id(1)

    @pl.when(s == 0)
    def _():
        sum_ref[...] = jnp.zeros_like(sum_ref)
        den_ref[...] = jnp.zeros_like(den_ref)

    h = hidden_ref[...]                         # (Bt, St, H)  f32
    m = mask_ref[...]                           # (Bt, St, 1)  f32 per-token

    sum_ref[...] += jnp.sum(h * m, axis=1)      # (Bt, H)  masked sum over seq
    den_ref[...] += jnp.sum(m, axis=1)          # (Bt, 1)  token count


def _masked_mean(sum_ref, den_ref):
    denom = jnp.maximum(den_ref[...], jnp.float32(1e-7))
    inv = pl.reciprocal(denom, approx=True)     # EUP slot
    inv = inv * (2.0 - denom * inv)             # one Newton step -> ~f32 exact
    return sum_ref[...] * inv                   # (Bt, H)


def _pooler_project_kernel(hidden_ref, mask_ref, w_ref, b_ref, out_ref,
                           sum_ref, den_ref):
    _masked_sum_step(hidden_ref, mask_ref, sum_ref, den_ref)

    @pl.when(pl.program_id(1) == pl.num_programs(1) - 1)
    def _():
        pooled = _masked_mean(sum_ref, den_ref)
        proj = jnp.dot(pooled, w_ref[...],
                       preferred_element_type=jnp.float32)   # MXU
        out_ref[...] = jnp.tanh(proj + b_ref[...])


def _pooler_identity_kernel(hidden_ref, mask_ref, out_ref, sum_ref, den_ref):
    _masked_sum_step(hidden_ref, mask_ref, sum_ref, den_ref)

    @pl.when(pl.program_id(1) == pl.num_programs(1) - 1)
    def _():
        out_ref[...] = _masked_mean(sum_ref, den_ref)


# --------------------------------------------------------------------------
# Tiling heuristic
# --------------------------------------------------------------------------
def _pick_tiles(B, S, H, itemsize=4, budget_bytes=8 * 1024 * 1024):
    """Pick (B_TILE, S_TILE) so one hidden block ~fits the per-buffer budget,
    respecting Mosaic's (8, 128) block-divisibility rules."""
    # Sequence tile: full S if one batch row fits, else a 128-multiple divisor.
    if S * H * itemsize <= budget_bytes:
        s_tile = S
    else:
        s_tile = S
        for cand in (4096, 2048, 1024, 512, 256, 128):
            if S % cand == 0:
                s_tile = cand
                break
    # Batch tile: as many rows as fit the budget; must equal B or be a
    # multiple of 8 that divides B (block rule on 2-D mask/output blocks).
    rows = max(1, budget_bytes // max(1, s_tile * H * itemsize))
    if rows >= B:
        b_tile = B
    else:
        b_tile = max(8, (rows // 8) * 8)
        while b_tile > 8 and B % b_tile != 0:
            b_tile -= 8
        if B % b_tile != 0:
            b_tile = B
    return b_tile, s_tile


# --------------------------------------------------------------------------
# Wrapper
# --------------------------------------------------------------------------
def base_entity_pooler(hidden, token_mask, weight, bias, insize, outsize):
    """hidden, token_mask: (B, S, insize); weight: (insize, outsize); bias: (outsize,).

    Module contract token_mask.shape == hidden.shape is kept, but only
    token_mask[..., :1] is shipped to the kernel (mask assumed broadcast over
    the feature dim, as in all BaseEntityPooler subclasses) to halve HBM
    traffic of the HBM-bound reduction.
    """
    assert hidden.shape == token_mask.shape
    B, S, H = hidden.shape
    assert H == insize

    hidden = hidden.astype(jnp.float32)
    mask_slim = token_mask[:, :, :1].astype(jnp.float32)     # (B, S, 1)

    b_tile, s_tile = _pick_tiles(B, S, H)
    assert B % b_tile == 0 and S % s_tile == 0
    grid = (B // b_tile, S // s_tile)
    project = (outsize != insize)

    scratch = [pltpu.VMEM((b_tile, H), jnp.float32),          # running sum
               pltpu.VMEM((b_tile, 1), jnp.float32)]          # running denom
    compiler_params = pltpu.CompilerParams(
        dimension_semantics=("parallel", "arbitrary"),
        vmem_limit_bytes=48 * 1024 * 1024)

    hidden_spec = pl.BlockSpec((b_tile, s_tile, H), lambda b, s: (b, s, 0))
    mask_spec = pl.BlockSpec((b_tile, s_tile, 1), lambda b, s: (b, s, 0))

    if not project:
        cost = pl.CostEstimate(
            flops=3 * B * S * H,
            transcendentals=B,
            bytes_accessed=int(hidden.nbytes + mask_slim.nbytes + B * H * 4))
        return pl.pallas_call(
            _pooler_identity_kernel,
            out_shape=jax.ShapeDtypeStruct((B, H), jnp.float32),
            grid_spec=pltpu.PrefetchScalarGridSpec(
                num_scalar_prefetch=0,
                grid=grid,
                in_specs=[hidden_spec, mask_spec],
                out_specs=pl.BlockSpec((b_tile, H), lambda b, s: (b, 0)),
                scratch_shapes=scratch),
            compiler_params=compiler_params,
            cost_estimate=cost,
        )(hidden, mask_slim)

    # Lane-dense projection path: pad output features to a multiple of 128 so
    # the final store is an unmasked vst; slice the pad off outside the kernel.
    o_pad = ((outsize + 127) // 128) * 128
    w_p = jnp.pad(weight.astype(jnp.float32), ((0, 0), (0, o_pad - outsize)))
    b_p = jnp.pad(bias.astype(jnp.float32).reshape(1, outsize),
                  ((0, 0), (0, o_pad - outsize)))

    cost = pl.CostEstimate(
        flops=3 * B * S * H + 2 * B * H * o_pad,
        transcendentals=B * o_pad + B,
        bytes_accessed=int(hidden.nbytes + mask_slim.nbytes + w_p.nbytes
                           + b_p.nbytes + B * o_pad * 4))

    out = pl.pallas_call(
        _pooler_project_kernel,
        out_shape=jax.ShapeDtypeStruct((B, o_pad), jnp.float32),
        grid_spec=pltpu.PrefetchScalarGridSpec(
            num_scalar_prefetch=0,
            grid=grid,
            in_specs=[hidden_spec, mask_spec,
                      pl.BlockSpec((H, o_pad), lambda b, s: (0, 0)),
                      pl.BlockSpec((1, o_pad), lambda b, s: (0, 0))],
            out_specs=pl.BlockSpec((b_tile, o_pad), lambda b, s: (b, 0)),
            scratch_shapes=scratch),
        compiler_params=compiler_params,
        cost_estimate=cost,
    )(hidden, mask_slim, w_p, b_p)
    return out[:, :outsize]


# --------------------------------------------------------------------------
# Reference + test
# --------------------------------------------------------------------------
def _reference(hidden, token_mask, weight, bias, insize, outsize):
    masked = hidden * token_mask
    denom = jnp.maximum(jnp.sum(token_mask, axis=1), 1e-7)
    pooled = jnp.sum(masked, axis=1) / denom
    if outsize == insize:
        return pooled
    return jnp.tanh(pooled @ weight + bias)


if __name__ == "__main__":
    B, S, insize, outsize = 2, 8, 32, 16

    key = jax.random.PRNGKey(0)
    k_h, k_m, k_w, k_b = jax.random.split(key, 4)

    hidden = jax.random.normal(k_h, (B, S, insize), dtype=jnp.float32)
    # Per-token binary mask, broadcast to hidden size (mask.shape == hidden.shape)
    tok = (jax.random.uniform(k_m, (B, S, 1)) > 0.3).astype(jnp.float32)
    token_mask = jnp.broadcast_to(tok, (B, S, insize))

    # Deterministic Linear(insize, outsize) params (synthetic init).
    weight = jax.random.normal(k_w, (insize, outsize), dtype=jnp.float32) * 0.05
    bias = jax.random.normal(k_b, (outsize,), dtype=jnp.float32) * 0.05

    # Projection path (outsize != insize): masked mean -> Linear -> Tanh.
    out = base_entity_pooler(hidden, token_mask, weight, bias, insize, outsize)
    out = jax.block_until_ready(out)
    ref = _reference(hidden, token_mask, weight, bias, insize, outsize)
    assert out.shape == (B, outsize)
    assert jnp.allclose(out, ref, atol=1e-4, rtol=1e-4), "mismatch (project)"

    # Identity path (outsize == insize): pooled returned directly, no W/b DMA.
    out_id = base_entity_pooler(hidden, token_mask,
                                jnp.eye(insize, dtype=jnp.float32),
                                jnp.zeros((insize,), jnp.float32),
                                insize, insize)
    out_id = jax.block_until_ready(out_id)
    ref_id = _reference(hidden, token_mask, None, None, insize, insize)
    assert out_id.shape == (B, insize)
    assert jnp.allclose(out_id, ref_id, atol=1e-4, rtol=1e-4), "mismatch (identity)"

    print("KERNEL_OK")
</pallas_src>

<mosaic_0001>
module attributes {stable_mosaic.version = 11 : i64} {
  func.func @_pooler_project_kernel(%arg0: i32, %arg1: i32, %arg2: memref<2x8x32xf32, #tpu.memory_space<vmem>>, %arg3: memref<2x8x1xf32, #tpu.memory_space<vmem>>, %arg4: memref<32x128xf32, #tpu.memory_space<vmem>>, %arg5: memref<1x128xf32, #tpu.memory_space<vmem>>, %arg6: memref<2x128xf32, #tpu.memory_space<vmem>>, %arg7: memref<2x32xf32, #tpu.memory_space<vmem>>, %arg8: memref<2x1xf32, #tpu.memory_space<vmem>>) attributes {dimension_semantics = [#tpu.dimension_semantics<parallel>, #tpu.dimension_semantics<arbitrary>], iteration_bounds = array<i64: 1, 1>, scalar_prefetch = 0 : i64, scratch_operands = 2 : i64, tpu.core_type = #tpu.core_type<tc>, window_params = [{transform_indices = @transform_0, window_bounds = array<i64: 2, 8, 32>}, {transform_indices = @transform_1, window_bounds = array<i64: 2, 8, 1>}, {pipeline_mode = #tpu.pipeline_mode<synchronous>, transform_indices = @transform_2, window_bounds = array<i64: 32, 128>}, {pipeline_mode = #tpu.pipeline_mode<synchronous>, transform_indices = @transform_3, window_bounds = array<i64: 1, 128>}, {transform_indices = @transform_4, window_bounds = array<i64: 2, 128>}]} {
    %c0_i32 = arith.constant 0 : i32
    %0 = arith.cmpi eq, %arg1, %c0_i32 : i32
    %1 = arith.extui %0 : i1 to i32
    %c0_i32_0 = arith.constant 0 : i32
    %2 = arith.cmpi ne, %1, %c0_i32_0 : i32
    scf.if %2 {
      %cst_17 = arith.constant 0.000000e+00 : f32
      %18 = vector.broadcast %cst_17 : f32 to vector<2x32xf32>
      %c0_18 = arith.constant 0 : index
      %c0_19 = arith.constant 0 : index
      %19 = vector.load %arg7[%c0_18, %c0_19] : memref<2x32xf32, #tpu.memory_space<vmem>>, vector<2x32xf32>
      tpu.vector_store %arg7[%c0_18, %c0_19], %18 {strides = array<i32>} : memref<2x32xf32, #tpu.memory_space<vmem>>, vector<2x32xf32>,
      %cst_20 = arith.constant 0.000000e+00 : f32
      %20 = vector.broadcast %cst_20 : f32 to vector<2x1xf32>
      %c0_21 = arith.constant 0 : index
      %c0_22 = arith.constant 0 : index
      %21 = vector.load %arg8[%c0_21, %c0_22] : memref<2x1xf32, #tpu.memory_space<vmem>>, vector<2x1xf32>
      tpu.vector_store %arg8[%c0_21, %c0_22], %20 {strides = array<i32>} : memref<2x1xf32, #tpu.memory_space<vmem>>, vector<2x1xf32>,
    } else {
    }
    %c0 = arith.constant 0 : index
    %c0_1 = arith.constant 0 : index
    %c0_2 = arith.constant 0 : index
    %3 = vector.load %arg2[%c0, %c0_1, %c0_2] : memref<2x8x32xf32, #tpu.memory_space<vmem>>, vector<2x8x32xf32>
    %c0_3 = arith.constant 0 : index
    %c0_4 = arith.constant 0 : index
    %c0_5 = arith.constant 0 : index
    %4 = vector.load %arg3[%c0_3, %c0_4, %c0_5] : memref<2x8x1xf32, #tpu.memory_space<vmem>>, vector<2x8x1xf32>
    %c0_6 = arith.constant 0 : index
    %c0_7 = arith.constant 0 : index
    %5 = vector.load %arg7[%c0_6, %c0_7] : memref<2x32xf32, #tpu.memory_space<vmem>>, vector<2x32xf32>
    %6 = vector.broadcast %4 : vector<2x8x1xf32> to vector<2x8x32xf32>
    %7 = arith.mulf %3, %6 : vector<2x8x32xf32>
    %cst = arith.constant dense<0.000000e+00> : vector<2x32xf32>
    %8 = vector.multi_reduction <add>, %7, %cst [1] : vector<2x8x32xf32> to vector<2x32xf32>
    %9 = arith.addf %5, %8 : vector<2x32xf32>
    %c0_8 = arith.constant 0 : index
    %c0_9 = arith.constant 0 : index
    %10 = vector.load %arg7[%c0_8, %c0_9] : memref<2x32xf32, #tpu.memory_space<vmem>>, vector<2x32xf32>
    tpu.vector_store %arg7[%c0_8, %c0_9], %9 {strides = array<i32>} : memref<2x32xf32, #tpu.memory_space<vmem>>, vector<2x32xf32>,
    %c0_10 = arith.constant 0 : index
    %c0_11 = arith.constant 0 : index
    %11 = vector.load %arg8[%c0_10, %c0_11] : memref<2x1xf32, #tpu.memory_space<vmem>>, vector<2x1xf32>
    %cst_12 = arith.constant dense<0.000000e+00> : vector<2x1xf32>
    %12 = vector.multi_reduction <add>, %4, %cst_12 [1] : vector<2x8x1xf32> to vector<2x1xf32>
    %13 = arith.addf %11, %12 : vector<2x1xf32>
    %c0_13 = arith.constant 0 : index
    %c0_14 = arith.constant 0 : index
    %14 = vector.load %arg8[%c0_13, %c0_14] : memref<2x1xf32, #tpu.memory_space<vmem>>, vector<2x1xf32>
    tpu.vector_store %arg8[%c0_13, %c0_14], %13 {strides = array<i32>} : memref<2x1xf32, #tpu.memory_space<vmem>>, vector<2x1xf32>,
    %c0_i32_15 = arith.constant 0 : i32
    %15 = arith.cmpi eq, %arg1, %c0_i32_15 : i32
    %16 = arith.extui %15 : i1 to i32
    %c0_i32_16 = arith.constant 0 : i32
    %17 = arith.cmpi ne, %16, %c0_i32_16 : i32
    scf.if %17 {
      %c0_17 = arith.constant 0 : index
      %c0_18 = arith.constant 0 : index
      %18 = vector.load %arg8[%c0_17, %c0_18] : memref<2x1xf32, #tpu.memory_space<vmem>>, vector<2x1xf32>
      %cst_19 = arith.constant 1.000000e-07 : f32
      %19 = vector.broadcast %cst_19 : f32 to vector<2x1xf32>
      %20 = arith.maximumf %18, %19 : vector<2x1xf32>
      %21 = tpu.reciprocal %20 {approx = true} : vector<2x1xf32> -> vector<2x1xf32>
      %22 = arith.mulf %20, %21 : vector<2x1xf32>
      %cst_20 = arith.constant 2.000000e+00 : f32
      %23 = vector.broadcast %cst_20 : f32 to vector<2x1xf32>
      %24 = arith.subf %23, %22 : vector<2x1xf32>
      %25 = arith.mulf %21, %24 : vector<2x1xf32>
      %c0_21 = arith.constant 0 : index
      %c0_22 = arith.constant 0 : index
      %26 = vector.load %arg7[%c0_21, %c0_22] : memref<2x32xf32, #tpu.memory_space<vmem>>, vector<2x32xf32>
      %27 = vector.broadcast %25 : vector<2x1xf32> to vector<2x32xf32>
      %28 = arith.mulf %26, %27 : vector<2x32xf32>
      %c0_23 = arith.constant 0 : index
      %c0_24 = arith.constant 0 : index
      %29 = vector.load %arg4[%c0_23, %c0_24] : memref<32x128xf32, #tpu.memory_space<vmem>>, vector<32x128xf32>
      %cst_25 = arith.constant dense<0.000000e+00> : vector<2x128xf32>
      %30 = tpu.matmul %28, %29, %cst_25 {dimension_numbers = #tpu.dot_dimension_numbers<[1], [0], [0], [1], [0, 0, 1, 1], [], []>} : vector<2x32xf32>, vector<32x128xf32>, vector<2x128xf32> -> vector<2x128xf32>
      %c0_26 = arith.constant 0 : index
      %c0_27 = arith.constant 0 : index
      %31 = vector.load %arg5[%c0_26, %c0_27] : memref<1x128xf32, #tpu.memory_space<vmem>>, vector<1x128xf32>
      %32 = vector.broadcast %31 : vector<1x128xf32> to vector<2x128xf32>
      %33 = arith.addf %30, %32 : vector<2x128xf32>
      %34 = math.tanh %33 : vector<2x128xf32>
      %c0_28 = arith.constant 0 : index
      %c0_29 = arith.constant 0 : index
      %35 = vector.load %arg6[%c0_28, %c0_29] : memref<2x128xf32, #tpu.memory_space<vmem>>, vector<2x128xf32>
      tpu.vector_store %arg6[%c0_28, %c0_29], %34 {strides = array<i32>} : memref<2x128xf32, #tpu.memory_space<vmem>>, vector<2x128xf32>,
    } else {
    }
    return
  }
  func.func @transform_0(%arg0: i32, %arg1: i32) -> (i32, i32, i32) {
    %c0_i32 = arith.constant 0 : i32
    %c0_i32_0 = arith.constant 0 : i32
    return %arg0, %arg1, %c0_i32 : i32, i32, i32
  }
  func.func @transform_1(%arg0: i32, %arg1: i32) -> (i32, i32, i32) {
    %c0_i32 = arith.constant 0 : i32
    %c0_i32_0 = arith.constant 0 : i32
    return %arg0, %arg1, %c0_i32 : i32, i32, i32
  }
  func.func @transform_2(%arg0: i32, %arg1: i32) -> (i32, i32) {
    %c0_i32 = arith.constant 0 : i32
    %c0_i32_0 = arith.constant 0 : i32
    %c0_i32_1 = arith.constant 0 : i32
    return %c0_i32, %c0_i32_0 : i32, i32
  }
  func.func @transform_3(%arg0: i32, %arg1: i32) -> (i32, i32) {
    %c0_i32 = arith.constant 0 : i32
    %c0_i32_0 = arith.constant 0 : i32
    %c0_i32_1 = arith.constant 0 : i32
    return %c0_i32, %c0_i32_0 : i32, i32
  }
  func.func @transform_4(%arg0: i32, %arg1: i32) -> (i32, i32) {
    %c0_i32 = arith.constant 0 : i32
    %c0_i32_0 = arith.constant 0 : i32
    return %arg0, %c0_i32 : i32, i32
  }
}

</mosaic_0001>

<bundles_post_ra>
// kernel: tpu_custom_call.1
= control target key start
LH: loop header
LB: loop body
LE: loop exit
PB: predicated region body
PF: predicated region fallthrough
CT: control target
= control target key end

     0   :  { %9 = vsyncpa [#allocation5], 0  ;;  %s387_s0 = inlined_call_operand.vmem [shape: f32[2,8,32], index: 0, kind: input, shape index: {}]   ;;  %s388_s1 = inlined_call_operand.vmem [shape: f32[2,8,1], index: 1, kind: input, shape index: {}]   ;;  %s389_s2 = inlined_call_operand.hbm [shape: f32[32,128], index: 2, kind: input, shape index: {}]   ;;  %s390_s3 = inlined_call_operand.vmem [shape: f32[1,128], index: 3, kind: input, shape index: {}]   ;;  %s391_s4 = inlined_call_operand.hbm [shape: f32[2,128], index: 4, kind: output, shape index: {}]  }
   0x1   :  { %10 = vsyncpa [#allocation6], 0  ;;  %s306_s15 = smov [#allocation4]   ;;  %s258_s19 = scalar_lea.hbm %s389_s2, 512 }
   0x2   :  { %s20_s16 = sshll.u32 %s306_s15, 4  ;;  %p259_p0 = scmp.ne.s32.totalorder %s389_s2, %s258_s19  ;;  %s21_s16 = int_to_ptr.vmem [resolvable:$true] %s20_s16 }
   0x3   :  { %p262_p1 = scmp.lt.u32.totalorder %s258_s19, %s389_s2 }
   0x5   :  { %p264_p2 = pnand %p262_p1, %p259_p0 }
   0x7   :  { %267 = shalt.err (!%p264_p2)
}
   0x8   :  { %s268_s24 = scalar_lea.vmem %s21_s16, 512  ;;  %p273_p4 = scmp.lt.s32.totalorder %s21_s16, %s21_s16 }
   0x9   :  { %p269_p3 = scmp.ne.s32.totalorder %s21_s16, %s268_s24  ;;  %p274_p5 = scmp.lt.s32.totalorder %s268_s24, %s268_s24 }
   0xb   :  { %p275_p6 = por %p274_p5, %p273_p4 }
   0xd   :  { %p276_p7 = pnand %p275_p6, %p269_p3 }
   0xf   :  { %279 = shalt.err (!%p276_p7)
}
  0x10   :  { %s307_s25 = smov 128   ;;  %s308_s26 = smov 8  }
  0x11   :  { %26 = dma.hbm_to_vmem [thread:$0]  %s389_s2, 512, %s21_s16, [#allocation5], %s307_s25, %s307_s25, %s308_s26  }
  0x12   :  { %302 = dma.done.wait [#allocation5], 512  }
  0x13   :  { %303 = vsyncadd [#allocation5], 4294966784  ;;  %vm38_vm0 = vcmask 1024   ;;  %v309_v0 = vmov 0   ;;  %v310_v1 = vmov 0.0   ;;  %vm81_vm1 = vcmask 7168  }
  0x14   :  { %252 = vset.pattern.permute.xlu0 %v309_v0  ;;  %39 = vst.msk [vmem:[#allocation3] sm:$0x3] %vm38_vm0, %v310_v1  ;;  %253 = vset.pattern.permute.xlu1 %v309_v0  ;;  %v42_v2 = vld [vmem:[%s388_s1] sm:$0xff]  ;;  %v43_v3 = vld [vmem:[%s388_s1 + $0x8] sm:$0xff]  ;;  %vm74_vm2 = vcmask 1041409   ;;  %vm36_vm3 = vcmask 254976  }
  0x15   :  { %47 = vperm.xlu0 %252, %v42_v2   ;;  %v82_v4 = vsel %vm81_vm1, %v42_v2, 0.0  ;;  %v89_v5 = vsel %vm81_vm1, %v43_v3, 0.0  ;;  %37 = vst.msk [vmem:[#allocation2] sm:$0x3] %vm36_vm3, %v310_v1  ;;  %v119_v21 = vld [vmem:[#allocation4] sm:$0xff]  ;;  %v120_v22 = vld [vmem:[#allocation4 + $0x8] sm:$0xff] }
  0x16   :  { %v83_v6 = vrot.slane %v82_v4, 4  ;;  %v90_v7 = vrot.slane %v89_v5, 4  ;;  %v121_v23 = vld [vmem:[#allocation4 + $0x10] sm:$0xff]  ;;  %v311_v25 = vmov 0.0|0.0   ;;  %v239_v26 = vpack.c.bf16 %v120_v22, %v119_v21  ;;  %v122_v27 = vld [vmem:[#allocation4 + $0x18] sm:$0xff]  ;;  %v41_v37 = vld [vmem:[%s387_s0 + $0x8] sm:$0xff] }
  0x17   :  { %238 = vmatprep.subr.bf16.mxu0 %v311_v25  ;;  %v242_v29 = vpack.c.bf16 %v122_v27, %v121_v23  ;;  %vm312_vm4 = vmmov 0   ;;  %v40_v34 = vld [vmem:[%s387_s0] sm:$0xff]  ;;  %vm57_vm5 = vcmask 261120   ;;  %s313_s10 = smov [#allocation7]  }
  0x18   :  { %v84_v8 = vadd.f32 %v83_v6, %v82_v4  ;;  %v91_v9 = vadd.f32 %v90_v7, %v89_v5  ;;  %240 = vmatpush3.bf16.msra.mxu0 %v239_v26  ;;  %235 = vmatprep.mubr.msk.f32.mxu0 %vm312_vm4, %v310_v1  ;;  %v220_v60 = vld [vmem:[%s390_s3] ss:$0 sm:$0xff]  ;;  %s211_s11 = sshll.u32 %s313_s10, 4  ;;  %s212_s11 = int_to_ptr.vmem [resolvable:$true] %s211_s11 }
  0x19   :  { %52 = vperm.xlu0 %252, %v43_v3   ;;  %241 = vmatprep.subr.bf16.mxu0 %v311_v25  ;;  %s280_s12 = scalar_lea.vmem %s212_s11, 32  ;;  %p285_p9 = scmp.lt.s32.totalorder %s212_s11, %s212_s11 }
  0x1a   :  { %v85_v10 = vrot.slane %v84_v8, 2  ;;  %v92_v11 = vrot.slane %v91_v9, 2  ;;  %p281_p8 = scmp.ne.s32.totalorder %s212_s11, %s280_s12  ;;  %p286_p10 = scmp.lt.s32.totalorder %s280_s12, %s280_s12 }
  0x1b   :  { %v80_v18 = vld [vmem:[#allocation3] sm:$0x3] }
  0x1c   :  { %v86_v12 = vadd.f32 %v85_v10, %v84_v8  ;;  %v93_v13 = vadd.f32 %v92_v11, %v91_v9  ;;  %243 = vmatpush3.bf16.msra.mxu0 %v242_v29  ;;  %v44_v53 = vld [vmem:[#allocation2] sm:$0x3]  ;;  %p287_p11 = por %p286_p10, %p285_p9 }
  0x1e   :  { %v87_v14 = vrot.slane %v86_v12, 1  ;;  %v94_v15 = vrot.slane %v93_v13, 1  ;;  %p288_p12 = pnand %p287_p11, %p281_p8 }
  0x20   :  { %v88_v16 = vadd.f32 %v87_v14, %v86_v12  ;;  %v95_v17 = vadd.f32 %v94_v15, %v93_v13 }
  0x22   :  { %v98_v19 = vsel %vm74_vm2, %v95_v17, %v88_v16 }
  0x23   :  { %v100_v20 = vadd.f32 %v98_v19, %v80_v18 }
  0x25   :  { %102 = vst.msk [vmem:[#allocation3] sm:$0x3] %vm38_vm0, %v100_v20 }
  0x2c   :  { %v106_v24 = vld [vmem:[#allocation3] sm:$0x3] }
  0x2d   :  { %v107_v28 = vmax.f32 %v106_v24, 1e-07 }
  0x2f   :  { %254 = vrcp.f32 %v107_v28 }
  0x39   :  { %v255_v30 = vpop.eup %254 }
  0x3a   :  { %v109_v31 = vmul.f32 %v255_v30, %v107_v28 }
  0x3c   :  { %v110_v32 = vsub.f32 2.0, %v109_v31 }
  0x3e   :  { %v111_v33 = vmul.f32 %v255_v30, %v110_v32 }
  0x40   :  { %115 = vperm.xlu1 %253, %v111_v33  }
  0x94   :  { %v48_v35 = vpop.permute.xlu0 %47 }
  0x95   :  { %v55_v36 = vmul.f32 %v48_v35, %v40_v34 }
  0x97   :  { %v58_v38 = vsel %vm57_vm5, %v55_v36, 0.0 }
  0x98   :  { %v59_v39 = vrot.slane %v58_v38, 4  ;;  %v53_v40 = vpop.permute.xlu0 %52 }
  0x99   :  { %v56_v41 = vmul.f32 %v53_v40, %v41_v37 }
  0x9a   :  { %v60_v42 = vadd.f32 %v59_v39, %v58_v38 }
  0x9b   :  { %v65_v43 = vsel %vm57_vm5, %v56_v41, 0.0 }
  0x9c   :  { %v61_v44 = vrot.slane %v60_v42, 2  ;;  %v66_v45 = vrot.slane %v65_v43, 4 }
  0x9e   :  { %v62_v46 = vadd.f32 %v61_v44, %v60_v42  ;;  %v67_v47 = vadd.f32 %v66_v45, %v65_v43 }
  0xa0   :  { %v63_v48 = vrot.slane %v62_v46, 1  ;;  %v68_v49 = vrot.slane %v67_v47, 2 }
  0xa2   :  { %v69_v50 = vadd.f32 %v68_v49, %v67_v47  ;;  %v64_v51 = vadd.f32 %v63_v48, %v62_v46 }
  0xa4   :  { %v70_v52 = vrot.slane %v69_v50, 1 }
  0xa6   :  { %v71_v54 = vadd.f32 %v70_v52, %v69_v50 }
  0xa8   :  { %v75_v55 = vsel %vm74_vm2, %v71_v54, %v64_v51 }
  0xa9   :  { %v77_v56 = vadd.f32 %v75_v55, %v44_v53 }
  0xab   :  { %79 = vst.msk [vmem:[#allocation2] sm:$0x3] %vm36_vm3, %v77_v56 }
  0xb2   :  { %v112_v58 = vld [vmem:[#allocation2] sm:$0x3] }
  0xbf   :  { %v116_v57 = vpop.permute.xlu1 %115 }
  0xc0   :  { %v118_v59 = vmul.f32 %v116_v57, %v112_v58 }
  0xc2   :  { %236 = vmatmul.mubr.msk.f32.vlgmr.msra.gmra.mrb[0].mxu0 %vm57_vm5, %v118_v59 }
 0x195   :  { %v199_v61 = vpop.f32.mrb[0].mxu0 }
 0x196   :  { %v200_v62 = vadd.f32 %v220_v60, %v199_v61  ;;  %v237_v63 = vpop.f32.mrb[1].mxu0 }
 0x198   :  { %256 = vtanh.f32 %v200_v62 }
 0x1a2   :  { %v257_v0 = vpop.eup %256 }
 0x1a3   :  { %204 = vst [vmem:[#allocation7] sm:$0x3] %v257_v0 }
 0x1a4   :  { %291 = shalt.err (!%p288_p12)
}
 0x1a5   :  { %s292_s3 = scalar_lea.hbm %s391_s4, 32 }
 0x1a6   :  { %p293_p13 = scmp.ne.s32.totalorder %s391_s4, %s292_s3  ;;  %p296_p0 = scmp.lt.u32.totalorder %s292_s3, %s391_s4 }
 0x1a8   :  { %p298_p1 = pnand %p296_p0, %p293_p13 }
 0x1aa   :  { %301 = shalt.err (!%p298_p1)
}
 0x1ab   :  { %214 = dma.vmem_to_hbm [thread:$0]  %s212_s11, 32, %s391_s4, [#allocation6]  }
 0x1ac   :  { %304 = dma.done.wait [#allocation6], 32  }
 0x1ad   :  { %305 = vsyncadd [#allocation6], 4294967264 }
 0x1ae   :  { %218 = vsyncpa [#allocation5], 1 }
 0x1af   :  { %219 = vsyncpa [#allocation6], 1 }

</bundles_post_ra>
